<compile_context>
chip_gen: v7x
topology: tpu7x:2x2x1
jax: 0.10.0
libtpu: 0.0.40
codegen_flags: <defaults>
</compile_context>

<pallas_src>
import jax
import jax.numpy as jnp
from jax.experimental import pallas as pl
from jax.experimental.pallas import tpu as pltpu


# ----------------------------- Pallas kernel ------------------------------ #
def _netlgcn1_fused_kernel(xs_ref, wb_ref, o_ref):
    # xs_ref: (2, T)  lane-dense per-node stream: row 0 = x (in_c == 1), row 1 = S.
    # wb_ref: (d1, 4) resident params: col 0 = W1, col 1 = b1, col 2 = W2, col 3 = b2.
    # o_ref : (1, T)  lane-dense output (num_classes == 1).
    x = xs_ref[0:1, :]            # (1, T)
    s = xs_ref[1:2, :]            # (1, T)
    w1 = wb_ref[:, 0:1]           # (d1, 1) conv1 weight column
    b1 = wb_ref[:, 1:2]           # (d1, 1) conv1 bias
    w2 = wb_ref[:, 2:3]           # (d1, 1) conv2 weight column
    b2 = wb_ref[0:1, 3:4]         # (1, 1)  conv2 bias (scalar)

    # ---- layer 1 + ReLU (in_c == 1): VPU broadcast "outer product", no MXU.
    #      S * (x @ W1) + b1  ==  w1_col * (S * x) + b1_col   (scale on the 1-wide side)
    sx = s * x                                    # (1, T)
    h = jnp.maximum(w1 * sx + b1, 0.0)            # (d1, T), lane-dense SSA value

    # TODO(synk): F.dropout(p=0.5) between the layers is identity in eval mode;
    # training-mode dropout (PyTorch RNG) is not reproduced here.

    # ---- layer 2 (out_c == 1): elementwise multiply + sublane (XLU) reduce over d1.
    #      S * (h @ W2) + b2
    acc = jnp.sum(h * w2, axis=0, keepdims=True)  # (1, T)
    o_ref[...] = (s * acc + b2).astype(o_ref.dtype)


# ------------------------------ JAX glue ---------------------------------- #
def _round_up(a, b):
    return (a + b - 1) // b * b


def compute_edge_scale(edge_index, num_nodes):
    """S[i] = sum over self-loop-augmented edges e with row[e]==i of
    deg[row[e]]^-0.5 * deg[col[e]]^-0.5   (all edge weights are 1)."""
    row, col = edge_index[0], edge_index[1]
    loop = jnp.arange(num_nodes, dtype=edge_index.dtype)
    row = jnp.concatenate([row, loop])
    col = jnp.concatenate([col, loop])
    w = jnp.ones(row.shape[0], dtype=jnp.float32)
    deg = jax.ops.segment_sum(w, row, num_segments=num_nodes)
    # Guard before the rsqrt (self-loops guarantee deg >= 1, but stay safe).
    deg_safe = jnp.where(deg > 0, deg, 1.0)
    deg_inv = jnp.where(deg > 0, jax.lax.rsqrt(deg_safe), 0.0)
    norm = deg_inv[row] * w * deg_inv[col]
    return jax.ops.segment_sum(norm, row, num_segments=num_nodes)   # (N,)


def net_lgcn1_forward(x, edge_index, params, *, use_pallas=None):
    n, in_c = x.shape
    d1 = params["w1"].shape[1]
    out_c = params["w2"].shape[1]
    # Fused kernel is specialized to NetLGCN1's defaults (num_features=1, num_classes=1).
    assert in_c == 1 and out_c == 1, (in_c, out_c)

    # Graph normalization scalars (cheap glue; fused by jit around the kernel).
    s = compute_edge_scale(edge_index, n)                           # (N,) f32

    if use_pallas is None:
        use_pallas = n >= 512
    if not use_pallas:
        # Tiny graphs: single-grid-step + launch overhead dominates; plain XLA wins.
        h = jnp.maximum(s[:, None] * (x.astype(jnp.float32) @ params["w1"])
                        + params["b1"], 0.0)
        return (s[:, None] * (h @ params["w2"]) + params["b2"]).astype(x.dtype)

    # Node axis on LANES: pack [x ; S] as a (2, N_pad) stream.
    xs_t = jnp.stack([x[:, 0].astype(jnp.float32), s.astype(jnp.float32)], axis=0)

    # Row-tile cap 8192 lanes (sweepable): per-tile VMEM footprint is a few
    # hundred KiB, far below the 32 MiB scoped default on every generation,
    # while amortising the ~0.35us fixed per-grid-step overhead.
    tile_n = min(8192, _round_up(n, 128))
    n_pad = _round_up(n, tile_n)
    xs_t = jnp.pad(xs_t, ((0, 0), (0, n_pad - n)))

    # Resident parameter block (d1, 4): col 0 = W1, col 1 = b1, col 2 = W2, col 3 = b2.
    w1c = params["w1"].reshape(d1, 1).astype(jnp.float32)
    b1c = params["b1"].reshape(d1, 1).astype(jnp.float32)
    w2c = params["w2"].reshape(d1, 1).astype(jnp.float32)
    b2c = jnp.broadcast_to(params["b2"].reshape(1, 1).astype(jnp.float32), (d1, 1))
    wb = jnp.concatenate([w1c, b1c, w2c, b2c], axis=1)              # (d1, 4)

    # TODO(synk): on v7x, an explicit 2-TensorCore split (leading grid axis with
    # pltpu.CORE_PARALLEL or pl.core_map) may beat plain "parallel" semantics.
    out_pad = pl.pallas_call(
        _netlgcn1_fused_kernel,
        out_shape=jax.ShapeDtypeStruct((1, n_pad), x.dtype),
        grid_spec=pltpu.PrefetchScalarGridSpec(
            num_scalar_prefetch=0,
            grid=(n_pad // tile_n,),
            in_specs=[
                pl.BlockSpec((2, tile_n), lambda i: (0, i)),   # [x ; S], streamed lane-dense
                pl.BlockSpec((d1, 4), lambda i: (0, 0)),       # params, resident
            ],
            out_specs=pl.BlockSpec((1, tile_n), lambda i: (0, i)),
        ),
        compiler_params=pltpu.CompilerParams(
            dimension_semantics=("parallel",),
        ),
        cost_estimate=pl.CostEstimate(
            flops=5 * n_pad * d1,        # ~5*d1 VALU ops per node
            transcendentals=0,
            bytes_accessed=12 * n_pad,   # 8 B read + 4 B write per node
        ),
    )(xs_t, wb)

    # Cheap epilogue: slice the (1, N_pad) lane-dense slab back to (N, num_classes).
    return out_pad[0, :n][:, None]


def glorot(key, shape):
    fan_in, fan_out = shape
    limit = (6.0 / (fan_in + fan_out)) ** 0.5
    return jax.random.uniform(key, shape, jnp.float32, -limit, limit)


# --------------------------------- main ------------------------------------ #
if __name__ == "__main__":
    key = jax.random.PRNGKey(0)
    k_x, k_src, k_dst, k_w1, k_w2 = jax.random.split(key, 5)

    num_nodes = 1000          # exercises padding (n_pad = 1024) and the pallas path
    num_features = 1
    d1 = 16
    num_classes = 1
    num_edges = 4000

    # Node features [N, num_features]
    x = jax.random.normal(k_x, (num_nodes, num_features), dtype=jnp.float32)

    # Deterministic random directed graph: edge_index [2, E]
    src = jax.random.randint(k_src, (num_edges,), 0, num_nodes, dtype=jnp.int32)
    dst = jax.random.randint(k_dst, (num_edges,), 0, num_nodes, dtype=jnp.int32)
    edge_index = jnp.stack([src, dst], axis=0)

    # Deterministic parameter init (glorot weights, zero biases),
    # mirroring LinkGCNConv.reset_parameters().
    params = {
        "w1": glorot(k_w1, (num_features, d1)),
        "b1": jnp.zeros((d1,), jnp.float32),
        "w2": glorot(k_w2, (d1, num_classes)),
        "b2": jnp.zeros((num_classes,), jnp.float32),
    }

    fwd = jax.jit(net_lgcn1_forward)   # fuses the S segment-sums around the kernel
    out = fwd(x, edge_index, params)
    jax.block_until_ready(out)
    assert out.shape == (num_nodes, num_classes), out.shape

    # Pure-JAX reference (same collapsed semantics) for a correctness check.
    s_ref = compute_edge_scale(edge_index, num_nodes)
    h_ref = jnp.maximum(s_ref[:, None] * (x @ params["w1"]) + params["b1"], 0.0)
    ref = s_ref[:, None] * (h_ref @ params["w2"]) + params["b2"]
    assert jnp.allclose(out, ref, rtol=1e-5, atol=1e-5)

    print("KERNEL_OK")
</pallas_src>

<mosaic_0001>
module attributes {stable_mosaic.version = 11 : i64} {
  func.func @_netlgcn1_fused_kernel(%arg0: i32, %arg1: memref<2x1024xf32, #tpu.memory_space<vmem>>, %arg2: memref<16x4xf32, #tpu.memory_space<vmem>>, %arg3: memref<1x1024xf32, #tpu.memory_space<vmem>>) attributes {dimension_semantics = [#tpu.dimension_semantics<parallel>], iteration_bounds = array<i64: 1>, scalar_prefetch = 0 : i64, scratch_operands = 0 : i64, tpu.core_type = #tpu.core_type<tc>, window_params = [{transform_indices = @transform_0, window_bounds = array<i64: 2, 1024>}, {pipeline_mode = #tpu.pipeline_mode<synchronous>, transform_indices = @transform_1, window_bounds = array<i64: 16, 4>}, {transform_indices = @transform_2, window_bounds = array<i64: 1, 1024>}]} {
    %c0 = arith.constant 0 : index
    %c0_0 = arith.constant 0 : index
    %0 = vector.load %arg1[%c0, %c0_0] : memref<2x1024xf32, #tpu.memory_space<vmem>>, vector<1x1024xf32>
    %c1 = arith.constant 1 : index
    %c0_1 = arith.constant 0 : index
    %1 = vector.load %arg1[%c1, %c0_1] : memref<2x1024xf32, #tpu.memory_space<vmem>>, vector<1x1024xf32>
    %c0_2 = arith.constant 0 : index
    %c0_3 = arith.constant 0 : index
    %2 = vector.load %arg2[%c0_2, %c0_3] : memref<16x4xf32, #tpu.memory_space<vmem>>, vector<16x1xf32>
    %c0_4 = arith.constant 0 : index
    %c1_5 = arith.constant 1 : index
    %3 = vector.load %arg2[%c0_4, %c1_5] : memref<16x4xf32, #tpu.memory_space<vmem>>, vector<16x1xf32>
    %c0_6 = arith.constant 0 : index
    %c2 = arith.constant 2 : index
    %4 = vector.load %arg2[%c0_6, %c2] : memref<16x4xf32, #tpu.memory_space<vmem>>, vector<16x1xf32>
    %c0_7 = arith.constant 0 : index
    %c3 = arith.constant 3 : index
    %5 = vector.load %arg2[%c0_7, %c3] : memref<16x4xf32, #tpu.memory_space<vmem>>, vector<1x1xf32>
    %6 = arith.mulf %1, %0 : vector<1x1024xf32>
    %7 = vector.broadcast %2 : vector<16x1xf32> to vector<16x1024xf32>
    %8 = vector.broadcast %6 : vector<1x1024xf32> to vector<16x1024xf32>
    %9 = arith.mulf %7, %8 : vector<16x1024xf32>
    %10 = vector.broadcast %3 : vector<16x1xf32> to vector<16x1024xf32>
    %11 = arith.addf %9, %10 : vector<16x1024xf32>
    %cst = arith.constant 0.000000e+00 : f32
    %12 = vector.broadcast %cst : f32 to vector<16x1024xf32>
    %13 = arith.maximumf %11, %12 : vector<16x1024xf32>
    %14 = vector.broadcast %4 : vector<16x1xf32> to vector<16x1024xf32>
    %15 = arith.mulf %13, %14 : vector<16x1024xf32>
    %cst_8 = arith.constant dense<0.000000e+00> : vector<1024xf32>
    %16 = vector.multi_reduction <add>, %15, %cst_8 [0] : vector<16x1024xf32> to vector<1024xf32>
    %17 = vector.shape_cast %16 : vector<1024xf32> to vector<1x1024xf32>
    %18 = arith.mulf %1, %17 : vector<1x1024xf32>
    %19 = vector.broadcast %5 : vector<1x1xf32> to vector<1x1024xf32>
    %20 = arith.addf %18, %19 : vector<1x1024xf32>
    %c0_9 = arith.constant 0 : index
    %c0_10 = arith.constant 0 : index
    %21 = vector.load %arg3[%c0_9, %c0_10] : memref<1x1024xf32, #tpu.memory_space<vmem>>, vector<1x1024xf32>
    tpu.vector_store %arg3[%c0_9, %c0_10], %20 {strides = array<i32>} : memref<1x1024xf32, #tpu.memory_space<vmem>>, vector<1x1024xf32>,
    return
  }
  func.func @transform_0(%arg0: i32) -> (i32, i32) {
    %c0_i32 = arith.constant 0 : i32
    %c0_i32_0 = arith.constant 0 : i32
    return %c0_i32, %arg0 : i32, i32
  }
  func.func @transform_1(%arg0: i32) -> (i32, i32) {
    %c0_i32 = arith.constant 0 : i32
    %c0_i32_0 = arith.constant 0 : i32
    %c0_i32_1 = arith.constant 0 : i32
    return %c0_i32, %c0_i32_0 : i32, i32
  }
  func.func @transform_2(%arg0: i32) -> (i32, i32) {
    %c0_i32 = arith.constant 0 : i32
    %c0_i32_0 = arith.constant 0 : i32
    return %c0_i32, %arg0 : i32, i32
  }
}

</mosaic_0001>

<bundles_post_ra>
// kernel: mul.1
= control target key start
LH: loop header
LB: loop body
LE: loop exit
PB: predicated region body
PF: predicated region fallthrough
CT: control target
= control target key end

     0   :  { %s122_s0 = inlined_call_operand.vmem [shape: f32[5000], index: 0, kind: input, shape index: {}]   ;;  %s123_s1 = inlined_call_operand.vmem [shape: f32[5000], index: 1, kind: input, shape index: {}]   ;;  %s124_s2 = inlined_call_operand.vmem [shape: f32[5000], index: 2, kind: output, shape index: {}]  }
   0x1   :  { %v3_v0 = vld [vmem:[%s122_s0] sm:$0xff]  ;;  %v50_v2 = vld [vmem:[%s122_s0 + $0x8] sm:$0xff]  ;;  %v53_v5 = vld [vmem:[%s122_s0 + $0x10] sm:$0xff] }
   0x2   :  { %v4_v1 = vld [vmem:[%s123_s1] sm:$0xff]  ;;  %v51_v4 = vld [vmem:[%s123_s1 + $0x8] sm:$0xff]  ;;  %v54_v6 = vld [vmem:[%s123_s1 + $0x10] sm:$0xff] }
   0x3   :  { %v7_v3 = vmul.f32 %v4_v1, %v3_v0  ;;  %v16_v7 = vmul.f32 %v51_v4, %v50_v2  ;;  %v26_v8 = vmul.f32 %v54_v6, %v53_v5  ;;  %v56_v9 = vld [vmem:[%s122_s0 + $0x18] sm:$0xff]  ;;  %v59_v11 = vld [vmem:[%s122_s0 + $0x20] sm:$0xff] }
   0x4   :  { %v57_v10 = vld [vmem:[%s123_s1 + $0x18] sm:$0xff]  ;;  %v60_v13 = vld [vmem:[%s123_s1 + $0x20] sm:$0xff] }
   0x5   :  { %9 = vst [vmem:[%s124_s2] sm:$0xff] %v7_v3  ;;  %v36_v12 = vmul.f32 %v57_v10, %v56_v9  ;;  %52 = vst [vmem:[%s124_s2 + $0x8] sm:$0xff] %v16_v7  ;;  %v46_v14 = vmul.f32 %v60_v13, %v59_v11 }
   0x6   :  { %55 = vst [vmem:[%s124_s2 + $0x10] sm:$0xff] %v26_v8 }
   0x7   :  { %58 = vst [vmem:[%s124_s2 + $0x18] sm:$0xff] %v36_v12  ;;  %61 = vst [vmem:[%s124_s2 + $0x20] sm:$0xff] %v46_v14 }

// kernel: net_lgcn1_forward.1
= control target key start
LH: loop header
LB: loop body
LE: loop exit
PB: predicated region body
PF: predicated region fallthrough
CT: control target
= control target key end

     0   :  { %v291_v0 = vmov 1   ;;  %v292_v1 = vmov 0   ;;  %v293_v4 = vmov 2   ;;  %v294_v6 = vmov 3   ;;  %s356_s1 = inlined_call_operand.vmem [shape: f32[16,4], index: 1, kind: input, shape index: {}]   ;;  %s357_s0 = inlined_call_operand.vmem [shape: f32[2,1024], index: 0, kind: input, shape index: {}]   ;;  %s358_s2 = inlined_call_operand.vmem [shape: f32[1,1024], index: 2, kind: output, shape index: {}]  }
   0x1   :  { %286 = vset.pattern.permute.xlu1 %v291_v0  ;;  %285 = vset.pattern.permute.xlu0 %v292_v1  ;;  %v14_v2 = vld [vmem:[%s356_s1] sm:$0xff]  ;;  %v15_v3 = vld [vmem:[%s356_s1 + $0x8] sm:$0xff]  ;;  %v29_v7 = vlaneseq  ;;  %v295_v11 = vmov 1966171168  }
   0x2   :  { %86 = vperm.xlu1 %286, %v14_v2   ;;  %20 = vperm.xlu0 %285, %v14_v2   ;;  %v16_v5 = vld [vmem:[%s356_s1] sm:$0x1]  ;;  %v328_v10 = vld [vmem:[%s357_s0 + $0x1] ss:$2 sm:$0xff]  ;;  %v218_v12 = vunpack.c.l.s4 %v295_v11 }
   0x3   :  { %v11_v8 = vld [vmem:[%s357_s0] ss:$2 sm:$0xff]  ;;  %v323_v9 = vshrl.u32 %v29_v7, 7 }
   0x4   :  { %v17_v13 = vmul.f32 %v328_v10, %v11_v8  ;;  %v219_v22 = vunpack.c.0.s8 %v218_v12 }
   0x5   :  { %v31_v14 = vsub.s32 0, %v323_v9  ;;  %v35_v15 = vsub.s32 1, %v323_v9  ;;  %v39_v16 = vsub.s32 2, %v323_v9  ;;  %v43_v17 = vsub.s32 3, %v323_v9 }
   0x6   :  { %90 = vperm.xlu1 %286, %v15_v3   ;;  %25 = vperm.xlu0 %285, %v15_v3   ;;  %v47_v18 = vsub.s32 4, %v323_v9  ;;  %v51_v19 = vsub.s32 5, %v323_v9  ;;  %v55_v20 = vsub.s32 6, %v323_v9  ;;  %v59_v21 = vsub.s32 7, %v323_v9 }
   0x7   :  { %v32_v23 = vrot.slane %v17_v13, %v31_v14  ;;  %v36_v24 = vrot.slane %v17_v13, %v35_v15  ;;  %v40_v25 = vrot.slane %v17_v13, %v39_v16  ;;  %v44_v26 = vrot.slane %v17_v13, %v43_v17 }
   0x8   :  { %v48_v27 = vrot.slane %v17_v13, %v47_v18  ;;  %v52_v28 = vrot.slane %v17_v13, %v51_v19  ;;  %v56_v29 = vrot.slane %v17_v13, %v55_v20  ;;  %v60_v30 = vrot.slane %v17_v13, %v59_v21 }
   0x9   :  { %v342_v33 = vsub.s32 %v219_v22, %v323_v9 }
   0xa   :  { %287 = vset.pattern.permute.xlu0 %v293_v4  ;;  %288 = vset.pattern.permute.xlu1 %v293_v4 }
   0xb   :  { %126 = vperm.xlu0 %287, %v14_v2   ;;  %130 = vperm.xlu1 %288, %v15_v3  }
   0xf   :  { %289 = vset.pattern.permute.xlu1 %v294_v6  ;;  %290 = vset.pattern.permute.xlu0 %v294_v6 }
  0x10   :  { %266 = vperm.xlu1 %289, %v16_v5  }
  0x81   :  { %v87_v31 = vpop.permute.xlu1 %86  ;;  %v21_v32 = vpop.permute.xlu0 %20 }
  0x82   :  { %v69_v34 = vmul.f32 %v32_v23, %v21_v32  ;;  %v70_v35 = vmul.f32 %v36_v24, %v21_v32  ;;  %v71_v36 = vmul.f32 %v40_v25, %v21_v32  ;;  %v72_v37 = vmul.f32 %v44_v26, %v21_v32 }
  0x83   :  { %v73_v38 = vmul.f32 %v48_v27, %v21_v32  ;;  %v74_v39 = vmul.f32 %v52_v28, %v21_v32  ;;  %v75_v40 = vmul.f32 %v56_v29, %v21_v32  ;;  %v76_v41 = vmul.f32 %v60_v30, %v21_v32 }
  0x84   :  { %v93_v42 = vadd.f32 %v87_v31, %v69_v34  ;;  %v94_v43 = vadd.f32 %v87_v31, %v70_v35  ;;  %v95_v44 = vadd.f32 %v87_v31, %v71_v36  ;;  %v96_v45 = vadd.f32 %v87_v31, %v72_v37 }
  0x85   :  { %v26_v46 = vpop.permute.xlu0 %25  ;;  %v97_v47 = vadd.f32 %v87_v31, %v73_v38  ;;  %v98_v48 = vadd.f32 %v87_v31, %v74_v39  ;;  %v99_v49 = vadd.f32 %v87_v31, %v75_v40  ;;  %v100_v50 = vadd.f32 %v87_v31, %v76_v41  ;;  %v91_v55 = vpop.permute.xlu1 %90 }
  0x86   :  { %v77_v51 = vmul.f32 %v32_v23, %v26_v46  ;;  %v78_v52 = vmul.f32 %v36_v24, %v26_v46  ;;  %v79_v53 = vmul.f32 %v40_v25, %v26_v46  ;;  %v80_v54 = vmul.f32 %v44_v26, %v26_v46 }
  0x87   :  { %v81_v56 = vmul.f32 %v48_v27, %v26_v46  ;;  %v82_v57 = vmul.f32 %v52_v28, %v26_v46  ;;  %v83_v58 = vmul.f32 %v56_v29, %v26_v46  ;;  %v84_v59 = vmul.f32 %v60_v30, %v26_v46 }
  0x88   :  { %v101_v60 = vadd.f32 %v91_v55, %v77_v51  ;;  %v102_v61 = vadd.f32 %v91_v55, %v78_v52  ;;  %v103_v62 = vadd.f32 %v91_v55, %v79_v53  ;;  %v104_v63 = vadd.f32 %v91_v55, %v80_v54 }
  0x89   :  { %v105_v0 = vadd.f32 %v91_v55, %v81_v56  ;;  %v106_v1 = vadd.f32 %v91_v55, %v82_v57  ;;  %v107_v2 = vadd.f32 %v91_v55, %v83_v58  ;;  %v108_v3 = vadd.f32 %v91_v55, %v84_v59 }
  0x8a   :  { %v109_v4 = vmax.f32 %v93_v42, 0.0  ;;  %v110_v5 = vmax.f32 %v94_v43, 0.0  ;;  %v111_v6 = vmax.f32 %v95_v44, 0.0  ;;  %v112_v7 = vmax.f32 %v96_v45, 0.0  ;;  %v127_v8 = vpop.permute.xlu0 %126  ;;  %v131_v20 = vpop.permute.xlu1 %130 }
  0x8b   :  { %v113_v11 = vmax.f32 %v97_v47, 0.0  ;;  %v114_v12 = vmax.f32 %v98_v48, 0.0  ;;  %v115_v13 = vmax.f32 %v99_v49, 0.0  ;;  %v116_v15 = vmax.f32 %v100_v50, 0.0 }
  0x8c   :  { %v117_v16 = vmax.f32 %v101_v60, 0.0  ;;  %v118_v17 = vmax.f32 %v102_v61, 0.0  ;;  %v119_v18 = vmax.f32 %v103_v62, 0.0  ;;  %v120_v19 = vmax.f32 %v104_v63, 0.0 }
  0x8d   :  { %v121_v21 = vmax.f32 %v105_v0, 0.0  ;;  %v122_v22 = vmax.f32 %v106_v1, 0.0  ;;  %v123_v23 = vmax.f32 %v107_v2, 0.0  ;;  %v124_v24 = vmax.f32 %v108_v3, 0.0 }
  0x8e   :  { %v133_v25 = vmul.f32 %v127_v8, %v109_v4  ;;  %v134_v26 = vmul.f32 %v127_v8, %v110_v5  ;;  %v135_v27 = vmul.f32 %v127_v8, %v111_v6  ;;  %v136_v28 = vmul.f32 %v127_v8, %v112_v7 }
  0x8f   :  { %v137_v29 = vmul.f32 %v127_v8, %v113_v11  ;;  %v138_v30 = vmul.f32 %v127_v8, %v114_v12  ;;  %v139_v31 = vmul.f32 %v127_v8, %v115_v13  ;;  %v140_v32 = vmul.f32 %v127_v8, %v116_v15 }
  0x90   :  { %v141_v34 = vmul.f32 %v131_v20, %v117_v16  ;;  %v142_v35 = vmul.f32 %v131_v20, %v118_v17  ;;  %v143_v36 = vmul.f32 %v131_v20, %v119_v18  ;;  %v144_v37 = vmul.f32 %v131_v20, %v120_v19 }
  0x91   :  { %v145_v38 = vmul.f32 %v131_v20, %v121_v21  ;;  %v146_v39 = vmul.f32 %v131_v20, %v122_v22  ;;  %v147_v40 = vmul.f32 %v131_v20, %v123_v23  ;;  %v148_v41 = vmul.f32 %v131_v20, %v124_v24 }
  0x92   :  { %v149_v42 = vadd.f32 %v141_v34, %v133_v25  ;;  %v156_v43 = vadd.f32 %v142_v35, %v134_v26  ;;  %v163_v44 = vadd.f32 %v143_v36, %v135_v27  ;;  %v170_v45 = vadd.f32 %v144_v37, %v136_v28 }
  0x93   :  { %v177_v46 = vadd.f32 %v145_v38, %v137_v29  ;;  %v184_v47 = vadd.f32 %v146_v39, %v138_v30  ;;  %v191_v48 = vadd.f32 %v147_v40, %v139_v31  ;;  %v198_v49 = vadd.f32 %v148_v41, %v140_v32 }
  0x94   :  { %v150_v50 = vrot.slane %v149_v42, 4  ;;  %v157_v51 = vrot.slane %v156_v43, 4  ;;  %v164_v52 = vrot.slane %v163_v44, 4  ;;  %v171_v53 = vrot.slane %v170_v45, 4 }
  0x95   :  { %v178_v54 = vrot.slane %v177_v46, 4  ;;  %v185_v55 = vrot.slane %v184_v47, 4  ;;  %v192_v56 = vrot.slane %v191_v48, 4  ;;  %v199_v57 = vrot.slane %v198_v49, 4 }
  0x96   :  { %v151_v58 = vadd.f32 %v150_v50, %v149_v42  ;;  %v158_v59 = vadd.f32 %v157_v51, %v156_v43  ;;  %v165_v60 = vadd.f32 %v164_v52, %v163_v44  ;;  %v172_v61 = vadd.f32 %v171_v53, %v170_v45 }
  0x97   :  { %v179_v62 = vadd.f32 %v178_v54, %v177_v46  ;;  %v186_v63 = vadd.f32 %v185_v55, %v184_v47  ;;  %v193_v0 = vadd.f32 %v192_v56, %v191_v48  ;;  %v200_v1 = vadd.f32 %v199_v57, %v198_v49  ;;  %v267_v48 = vpop.permute.xlu1 %266 }
  0x98   :  { %v152_v2 = vrot.slane %v151_v58, 2  ;;  %v159_v3 = vrot.slane %v158_v59, 2  ;;  %v166_v4 = vrot.slane %v165_v60, 2  ;;  %v173_v5 = vrot.slane %v172_v61, 2 }
  0x99   :  { %v180_v6 = vrot.slane %v179_v62, 2  ;;  %v187_v7 = vrot.slane %v186_v63, 2  ;;  %v194_v8 = vrot.slane %v193_v0, 2  ;;  %v201_v11 = vrot.slane %v200_v1, 2 }
  0x9a   :  { %v153_v12 = vadd.f32 %v152_v2, %v151_v58  ;;  %v160_v13 = vadd.f32 %v159_v3, %v158_v59  ;;  %v167_v15 = vadd.f32 %v166_v4, %v165_v60  ;;  %v174_v16 = vadd.f32 %v173_v5, %v172_v61 }
  0x9b   :  { %v181_v17 = vadd.f32 %v180_v6, %v179_v62  ;;  %v188_v18 = vadd.f32 %v187_v7, %v186_v63  ;;  %v195_v19 = vadd.f32 %v194_v8, %v193_v0  ;;  %v202_v20 = vadd.f32 %v201_v11, %v200_v1 }
  0x9c   :  { %v154_v21 = vrot.slane %v153_v12, 1  ;;  %v161_v22 = vrot.slane %v160_v13, 1  ;;  %v168_v23 = vrot.slane %v167_v15, 1  ;;  %v175_v24 = vrot.slane %v174_v16, 1 }
  0x9d   :  { %v182_v25 = vrot.slane %v181_v17, 1  ;;  %v189_v26 = vrot.slane %v188_v18, 1  ;;  %v196_v27 = vrot.slane %v195_v19, 1  ;;  %v203_v28 = vrot.slane %v202_v20, 1 }
  0x9e   :  { %v155_v29 = vadd.f32 %v154_v21, %v153_v12  ;;  %v162_v30 = vadd.f32 %v161_v22, %v160_v13  ;;  %v169_v31 = vadd.f32 %v168_v23, %v167_v15  ;;  %v176_v32 = vadd.f32 %v175_v24, %v174_v16 }
  0x9f   :  { %v183_v34 = vadd.f32 %v182_v25, %v181_v17  ;;  %v190_v35 = vadd.f32 %v189_v26, %v188_v18  ;;  %v197_v36 = vadd.f32 %v196_v27, %v195_v19  ;;  %v204_v37 = vadd.f32 %v203_v28, %v202_v20 }
  0xa0   :  { %v213_v38 = vcombine.low %v155_v29, %v162_v30  ;;  %v214_v39 = vcombine.low %v169_v31, %v176_v32  ;;  %v271_v52 = vrot.slane %v267_v48, %v31_v14 }
  0xa1   :  { %v215_v40 = vcombine.low %v183_v34, %v190_v35  ;;  %v216_v41 = vcombine.low %v197_v36, %v204_v37 }
  0xa2   :  { %v223_v42 = vrot.slane %v213_v38, %v342_v33  ;;  %v230_v43 = vrot.slane %v214_v39, %v342_v33 }
  0xa3   :  { %v237_v44 = vrot.slane %v215_v40, %v342_v33  ;;  %v244_v45 = vrot.slane %v216_v41, %v342_v33 }
  0xa4   :  { %v245_v46 = vcombine.low %v223_v42, %v230_v43 }
  0xa5   :  { %v246_v47 = vcombine.low %v237_v44, %v244_v45 }
  0xa6   :  { %v253_v49 = vrot.slane %v245_v46, %v342_v33 }
  0xa7   :  { %v260_v50 = vrot.slane %v246_v47, %v342_v33 }
  0xa9   :  { %v261_v51 = vcombine.low %v253_v49, %v260_v50 }
  0xab   :  { %v263_v53 = vmul.f32 %v328_v10, %v261_v51 }
  0xad   :  { %v273_v54 = vadd.f32 %v271_v52, %v263_v53 }
  0xaf   :  { %274 = vst [vmem:[%s358_s2] sm:$0xff] %v273_v54 }

</bundles_post_ra>
